<compile_context>
chip_gen: v5e
topology: v5e:2x2
jax: 0.10.0
libtpu: 0.0.40
codegen_flags: <defaults>
</compile_context>

<pallas_src>
import math
from functools import partial

import jax
import jax.numpy as jnp
from jax.experimental import pallas as pl
from jax.experimental.pallas import tpu as pltpu


def _round_up(a, b):
    return (a + b - 1) // b * b


def _arc_margin_kernel(x_ref, w_ref, wrn_ref, label_ref,        # inputs
                       out_ref, rloss_ref,                      # outputs
                       xn_sc, m_sc, l_sc, p_sc,                 # scratch
                       *, scale, cos_m, sin_m, ls_eps, easy_margin,
                       num_classes, out_features, block_c, matmul_dtype):
    cj = pl.program_id(1)
    nc = pl.num_programs(1)

    # Once per batch tile: row-normalize x (EUP rsqrt) and reset the online
    # logsumexp / picked-logit accumulators.
    @pl.when(cj == 0)
    def _():
        x = x_ref[...]
        inv = jax.lax.rsqrt(jnp.maximum(jnp.sum(x * x, axis=1, keepdims=True),
                                        1e-24))      # == 1 / max(||x||, 1e-12)
        xn_sc[...] = (x * inv).astype(matmul_dtype)
        m_sc[...] = jnp.full(m_sc.shape, -1e30, m_sc.dtype)
        l_sc[...] = jnp.zeros(l_sc.shape, l_sc.dtype)
        p_sc[...] = jnp.zeros(p_sc.shape, p_sc.dtype)

    # Normalize the weight tile with the hoisted reciprocal row norms.
    w_n = (w_ref[...] * wrn_ref[...]).astype(matmul_dtype)      # (TC, D)
    x_n = xn_sc[...]                                            # (TB, D)

    # cosine = x_n @ w_n.T without materializing a transpose: contract dim 1 of both.
    cosine = jax.lax.dot_general(
        x_n, w_n, dimension_numbers=(((1,), (1,)), ((), ())),
        preferred_element_type=jnp.float32)                     # (TB, TC) f32

    # ArcFace margin.  Clamp the radicand at 0 (guards |cosine| > 1 by a ulp).
    sine = jnp.sqrt(jnp.maximum(1.0 - cosine * cosine, 0.0))
    phi = cosine * cos_m - sine * sin_m
    if easy_margin:
        phi = jnp.where(cosine > 0.0, phi, cosine)
    # NOTE: the reference module's easy_margin=False branch computes `phir` and
    # never uses it (dead code in the original); reproduced faithfully, so
    # th / mm intentionally do not appear here.

    tb, tc = cosine.shape
    class_ids = cj * block_c + jax.lax.broadcasted_iota(jnp.int32, (tb, tc), 1)
    tgt = class_ids == label_ref[...]                           # (TB, TC) bool

    if ls_eps > 0.0:
        on = 1.0 - ls_eps + ls_eps / out_features
        off = ls_eps / out_features
        oh = jnp.where(tgt, on, off)
        output = (cosine + oh * (phi - cosine)) * scale
    else:
        output = jnp.where(tgt, phi, cosine) * scale

    out_ref[...] = output

    # Online logsumexp over class tiles (CrossEntropyLoss; mean taken in wrapper).
    valid = class_ids < num_classes                             # mask padded classes
    s = jnp.where(valid, output, -1e30)
    m_new = jnp.maximum(m_sc[...], jnp.max(s, axis=1, keepdims=True))
    l_sc[...] = (jnp.exp(m_sc[...] - m_new) * l_sc[...]
                 + jnp.sum(jnp.exp(s - m_new), axis=1, keepdims=True))
    m_sc[...] = m_new
    p_sc[...] = p_sc[...] + jnp.sum(jnp.where(tgt, output, 0.0),
                                    axis=1, keepdims=True)

    @pl.when(cj == nc - 1)
    def _():
        rloss_ref[...] = m_sc[...] + jnp.log(l_sc[...]) - p_sc[...]


@partial(jax.jit, static_argnames=("scale", "cos_m", "sin_m", "ls_eps",
                                   "easy_margin", "block_b", "block_c",
                                   "matmul_dtype"))
def arc_margin_forward(x, weight, label, *, scale, cos_m, sin_m, ls_eps,
                       easy_margin, block_b=128, block_c=512,
                       matmul_dtype=jnp.bfloat16):
    B, D = x.shape
    C, D_w = weight.shape
    assert D == D_w, "F.linear contraction dim must equal out_features"

    TB = min(block_b, _round_up(B, 8))
    TC = min(block_c, _round_up(C, 128))        # lane-dense logits tile
    B_pad = _round_up(B, TB)
    C_pad = _round_up(C, TC)
    nb, nc = B_pad // TB, C_pad // TC

    x_p = jnp.zeros((B_pad, D), jnp.float32).at[:B].set(x.astype(jnp.float32))
    w_p = jnp.zeros((C_pad, D), jnp.float32).at[:C].set(weight.astype(jnp.float32))
    label_p = jnp.zeros((B_pad, 1), jnp.int32).at[:B, 0].set(label.astype(jnp.int32))

    # Hoisted once per call: reciprocal L2 row norms of the (padded) weight.
    w_rnorm = jax.lax.rsqrt(
        jnp.maximum(jnp.sum(w_p * w_p, axis=1, keepdims=True), 1e-24))

    kernel = partial(_arc_margin_kernel,
                     scale=float(scale), cos_m=float(cos_m), sin_m=float(sin_m),
                     ls_eps=float(ls_eps), easy_margin=bool(easy_margin),
                     num_classes=C, out_features=D, block_c=TC,
                     matmul_dtype=matmul_dtype)

    grid_spec = pltpu.PrefetchScalarGridSpec(
        num_scalar_prefetch=0,
        grid=(nb, nc),
        in_specs=[
            pl.BlockSpec((TB, D), lambda bi, cj: (bi, 0)),    # x tile
            pl.BlockSpec((TC, D), lambda bi, cj: (cj, 0)),    # weight tile
            pl.BlockSpec((TC, 1), lambda bi, cj: (cj, 0)),    # 1/||w|| rows
            pl.BlockSpec((TB, 1), lambda bi, cj: (bi, 0)),    # labels
        ],
        out_specs=(
            pl.BlockSpec((TB, TC), lambda bi, cj: (bi, cj)),  # logits
            pl.BlockSpec((TB, 1), lambda bi, cj: (bi, 0)),    # per-row CE loss
        ),
        scratch_shapes=[
            pltpu.VMEM((TB, D), matmul_dtype),   # cached normalized x tile
            pltpu.VMEM((TB, 1), jnp.float32),    # running max (m)
            pltpu.VMEM((TB, 1), jnp.float32),    # running sum-exp (l)
            pltpu.VMEM((TB, 1), jnp.float32),    # picked (target) logit
        ])

    logits_p, rloss_p = pl.pallas_call(
        kernel,
        out_shape=(jax.ShapeDtypeStruct((B_pad, C_pad), jnp.float32),
                   jax.ShapeDtypeStruct((B_pad, 1), jnp.float32)),
        grid_spec=grid_spec,
        compiler_params=pltpu.CompilerParams(
            dimension_semantics=("parallel", "arbitrary"),
            # Safe on v5e/v6e/v7x with the default tile sizes; raise (with bigger
            # block_c) on v6e's 128 MiB VMEM if desired.
            vmem_limit_bytes=32 * 1024 * 1024),
        cost_estimate=pl.CostEstimate(
            flops=2 * B_pad * C_pad * D,
            transcendentals=B_pad * C_pad + B_pad + C_pad,
            bytes_accessed=4 * (B_pad * D + C_pad * D + B_pad * C_pad
                                + C_pad + 2 * B_pad)),
    )(x_p, w_p, w_rnorm, label_p)

    logits = logits_p[:B, :C]
    loss = jnp.mean(rloss_p[:B, 0])   # padded batch rows excluded from the mean
    return logits, loss


class ArcMarginProductPallas:
    """JAX/Pallas port of the PyTorch ArcMarginProduct forward pass."""

    def __init__(self, in_features, out_features, scale=30.0, margin=0.5,
                 easy_margin=False, ls_eps=0.0, *, key,
                 block_b=128, block_c=512, matmul_dtype=jnp.bfloat16):
        self.in_features = int(in_features)     # rows of weight == logits width
        self.out_features = int(out_features)   # contraction (feature) dim
        self.scale = float(scale)
        self.margin = float(margin)
        self.ls_eps = float(ls_eps)
        self.easy_margin = bool(easy_margin)
        self.cos_m = math.cos(margin)
        self.sin_m = math.sin(margin)
        self.th = math.cos(math.pi - margin)            # kept for parity; unused
        self.mm = math.sin(math.pi - margin) * margin   # (dead `phir` branch)
        self.block_b = int(block_b)
        self.block_c = int(block_c)
        self.matmul_dtype = matmul_dtype
        # xavier_uniform on a (in_features, out_features) tensor
        bound = math.sqrt(6.0 / (in_features + out_features))
        self.weight = jax.random.uniform(
            key, (in_features, out_features), jnp.float32,
            minval=-bound, maxval=bound)

    def __call__(self, x, label, *, matmul_dtype=None):
        md = self.matmul_dtype if matmul_dtype is None else matmul_dtype
        return arc_margin_forward(
            x, self.weight, label,
            scale=self.scale, cos_m=self.cos_m, sin_m=self.sin_m,
            ls_eps=self.ls_eps, easy_margin=self.easy_margin,
            block_b=self.block_b, block_c=self.block_c, matmul_dtype=md)


def _reference(weight, x, label, *, scale, cos_m, sin_m, ls_eps, easy_margin,
               matmul_dtype=jnp.float32):
    """Pure-JAX mirror of the PyTorch forward (optionally with the same
    bf16 matmul-input cast as the kernel's fast path)."""
    C, D = weight.shape
    inv_x = jax.lax.rsqrt(jnp.maximum(jnp.sum(x * x, axis=1, keepdims=True), 1e-24))
    inv_w = jax.lax.rsqrt(jnp.maximum(jnp.sum(weight * weight, axis=1, keepdims=True),
                                      1e-24))
    x_n = (x * inv_x).astype(matmul_dtype)
    w_n = (weight * inv_w).astype(matmul_dtype)
    cosine = jnp.dot(x_n, w_n.T, preferred_element_type=jnp.float32,
                     precision=jax.lax.Precision.HIGHEST)
    sine = jnp.sqrt(jnp.maximum(1.0 - cosine ** 2, 0.0))
    phi = cosine * cos_m - sine * sin_m
    if easy_margin:
        phi = jnp.where(cosine > 0, phi, cosine)
    one_hot = jax.nn.one_hot(label, C, dtype=jnp.float32)
    oh = one_hot
    if ls_eps > 0:
        oh = (1.0 - ls_eps) * oh + ls_eps / D
    output = (oh * phi + (1.0 - oh) * cosine) * scale
    logp = jax.nn.log_softmax(output, axis=1)
    loss = -jnp.mean(jnp.sum(one_hot * logp, axis=1))
    return output, loss


if __name__ == "__main__":
    key = jax.random.PRNGKey(0)
    k_w, k_x, k_l = jax.random.split(key, 3)

    B = 8
    in_features = 16     # "classes" (rows of weight / logits width)
    out_features = 32    # feature / contraction dim

    x = jax.random.normal(k_x, (B, out_features), dtype=jnp.float32)
    label = jax.random.randint(k_l, (B,), 0, in_features, dtype=jnp.int32)

    for cfg in (dict(easy_margin=False, ls_eps=0.0),
                dict(easy_margin=True, ls_eps=0.1)):
        module = ArcMarginProductPallas(in_features, out_features,
                                        scale=30.0, margin=0.5, key=k_w, **cfg)
        ref_kwargs = dict(scale=module.scale, cos_m=module.cos_m,
                          sin_m=module.sin_m, ls_eps=module.ls_eps,
                          easy_margin=module.easy_margin)

        # 1) exact f32 matmul path — tight check against the PyTorch-equivalent ref.
        out32, loss32 = module(x, label, matmul_dtype=jnp.float32)
        jax.block_until_ready((out32, loss32))
        ref_out, ref_loss = _reference(module.weight, x, label,
                                       matmul_dtype=jnp.float32, **ref_kwargs)
        assert jnp.allclose(out32, ref_out, atol=1e-3, rtol=1e-3), cfg
        assert jnp.allclose(loss32, ref_loss, atol=1e-3, rtol=1e-3), cfg

        # 2) default bf16-matmul fast path — checked against a reference that applies
        #    the same bf16 cast before the (f32-accumulated) matmul.
        outbf, lossbf = module(x, label)
        jax.block_until_ready((outbf, lossbf))
        refb_out, refb_loss = _reference(module.weight, x, label,
                                         matmul_dtype=jnp.bfloat16, **ref_kwargs)
        assert jnp.allclose(outbf, refb_out, atol=2e-2, rtol=2e-2), cfg
        assert jnp.allclose(lossbf, refb_loss, atol=2e-2, rtol=2e-2), cfg

    print("KERNEL_OK")
</pallas_src>

<mosaic_0001>
module attributes {stable_mosaic.version = 11 : i64} {
  func.func @_arc_margin_kernel(%arg0: i32, %arg1: i32, %arg2: memref<8x32xf32, #tpu.memory_space<vmem>>, %arg3: memref<128x32xf32, #tpu.memory_space<vmem>>, %arg4: memref<128x1xf32, #tpu.memory_space<vmem>>, %arg5: memref<8x1xi32, #tpu.memory_space<vmem>>, %arg6: memref<8x128xf32, #tpu.memory_space<vmem>>, %arg7: memref<8x1xf32, #tpu.memory_space<vmem>>, %arg8: memref<8x32xf32, #tpu.memory_space<vmem>>, %arg9: memref<8x1xf32, #tpu.memory_space<vmem>>, %arg10: memref<8x1xf32, #tpu.memory_space<vmem>>, %arg11: memref<8x1xf32, #tpu.memory_space<vmem>>) attributes {dimension_semantics = [#tpu.dimension_semantics<parallel>, #tpu.dimension_semantics<arbitrary>], iteration_bounds = array<i64: 1, 1>, scalar_prefetch = 0 : i64, scratch_operands = 4 : i64, tpu.core_type = #tpu.core_type<tc>, window_params = [{transform_indices = @transform_0, window_bounds = array<i64: 8, 32>}, {transform_indices = @transform_1, window_bounds = array<i64: 128, 32>}, {transform_indices = @transform_2, window_bounds = array<i64: 128, 1>}, {transform_indices = @transform_3, window_bounds = array<i64: 8, 1>}, {transform_indices = @transform_4, window_bounds = array<i64: 8, 128>}, {transform_indices = @transform_5, window_bounds = array<i64: 8, 1>}]} {
    %c0_i32 = arith.constant 0 : i32
    %0 = arith.cmpi eq, %arg1, %c0_i32 : i32
    %1 = arith.extui %0 : i1 to i32
    %c0_i32_0 = arith.constant 0 : i32
    %2 = arith.cmpi ne, %1, %c0_i32_0 : i32
    scf.if %2 {
      %c0_36 = arith.constant 0 : index
      %c0_37 = arith.constant 0 : index
      %62 = vector.load %arg2[%c0_36, %c0_37] : memref<8x32xf32, #tpu.memory_space<vmem>>, vector<8x32xf32>
      %63 = arith.mulf %62, %62 : vector<8x32xf32>
      %cst_38 = arith.constant dense<0.000000e+00> : vector<8xf32>
      %64 = vector.multi_reduction <add>, %63, %cst_38 [1] : vector<8x32xf32> to vector<8xf32>
      %65 = vector.shape_cast %64 : vector<8xf32> to vector<8x1xf32>
      %cst_39 = arith.constant 1.000000e-24 : f32
      %66 = vector.broadcast %cst_39 : f32 to vector<8x1xf32>
      %67 = arith.maximumf %65, %66 : vector<8x1xf32>
      %68 = math.rsqrt %67 : vector<8x1xf32>
      %69 = vector.broadcast %68 : vector<8x1xf32> to vector<8x32xf32>
      %70 = arith.mulf %62, %69 : vector<8x32xf32>
      %c0_40 = arith.constant 0 : index
      %c0_41 = arith.constant 0 : index
      %71 = vector.load %arg8[%c0_40, %c0_41] : memref<8x32xf32, #tpu.memory_space<vmem>>, vector<8x32xf32>
      tpu.vector_store %arg8[%c0_40, %c0_41], %70 {strides = array<i32>} : memref<8x32xf32, #tpu.memory_space<vmem>>, vector<8x32xf32>,
      %cst_42 = arith.constant -1.000000e+30 : f32
      %72 = vector.broadcast %cst_42 : f32 to vector<8x1xf32>
      %c0_43 = arith.constant 0 : index
      %c0_44 = arith.constant 0 : index
      %73 = vector.load %arg9[%c0_43, %c0_44] : memref<8x1xf32, #tpu.memory_space<vmem>>, vector<8x1xf32>
      tpu.vector_store %arg9[%c0_43, %c0_44], %72 {strides = array<i32>} : memref<8x1xf32, #tpu.memory_space<vmem>>, vector<8x1xf32>,
      %cst_45 = arith.constant 0.000000e+00 : f32
      %74 = vector.broadcast %cst_45 : f32 to vector<8x1xf32>
      %c0_46 = arith.constant 0 : index
      %c0_47 = arith.constant 0 : index
      %75 = vector.load %arg10[%c0_46, %c0_47] : memref<8x1xf32, #tpu.memory_space<vmem>>, vector<8x1xf32>
      tpu.vector_store %arg10[%c0_46, %c0_47], %74 {strides = array<i32>} : memref<8x1xf32, #tpu.memory_space<vmem>>, vector<8x1xf32>,
      %cst_48 = arith.constant 0.000000e+00 : f32
      %76 = vector.broadcast %cst_48 : f32 to vector<8x1xf32>
      %c0_49 = arith.constant 0 : index
      %c0_50 = arith.constant 0 : index
      %77 = vector.load %arg11[%c0_49, %c0_50] : memref<8x1xf32, #tpu.memory_space<vmem>>, vector<8x1xf32>
      tpu.vector_store %arg11[%c0_49, %c0_50], %76 {strides = array<i32>} : memref<8x1xf32, #tpu.memory_space<vmem>>, vector<8x1xf32>,
    } else {
    }
    %c0 = arith.constant 0 : index
    %c0_1 = arith.constant 0 : index
    %3 = vector.load %arg3[%c0, %c0_1] : memref<128x32xf32, #tpu.memory_space<vmem>>, vector<128x32xf32>
    %c0_2 = arith.constant 0 : index
    %c0_3 = arith.constant 0 : index
    %4 = vector.load %arg4[%c0_2, %c0_3] : memref<128x1xf32, #tpu.memory_space<vmem>>, vector<128x1xf32>
    %5 = vector.broadcast %4 : vector<128x1xf32> to vector<128x32xf32>
    %6 = arith.mulf %3, %5 : vector<128x32xf32>
    %c0_4 = arith.constant 0 : index
    %c0_5 = arith.constant 0 : index
    %7 = vector.load %arg8[%c0_4, %c0_5] : memref<8x32xf32, #tpu.memory_space<vmem>>, vector<8x32xf32>
    %cst = arith.constant dense<0.000000e+00> : vector<8x128xf32>
    %8 = tpu.matmul %7, %6, %cst {dimension_numbers = #tpu.dot_dimension_numbers<[1], [1], [0], [0], [0, 0, 1, 0], [], []>} : vector<8x32xf32>, vector<128x32xf32>, vector<8x128xf32> -> vector<8x128xf32>
    %9 = arith.mulf %8, %8 : vector<8x128xf32>
    %cst_6 = arith.constant 1.000000e+00 : f32
    %10 = vector.broadcast %cst_6 : f32 to vector<8x128xf32>
    %11 = arith.subf %10, %9 : vector<8x128xf32>
    %cst_7 = arith.constant 0.000000e+00 : f32
    %12 = vector.broadcast %cst_7 : f32 to vector<8x128xf32>
    %13 = arith.maximumf %11, %12 : vector<8x128xf32>
    %14 = math.sqrt %13 : vector<8x128xf32>
    %cst_8 = arith.constant 0.87758255 : f32
    %15 = vector.broadcast %cst_8 : f32 to vector<8x128xf32>
    %16 = arith.mulf %8, %15 : vector<8x128xf32>
    %cst_9 = arith.constant 0.47942555 : f32
    %17 = vector.broadcast %cst_9 : f32 to vector<8x128xf32>
    %18 = arith.mulf %14, %17 : vector<8x128xf32>
    %19 = arith.subf %16, %18 : vector<8x128xf32>
    %c128_i32 = arith.constant 128 : i32
    %20 = arith.muli %arg1, %c128_i32 : i32
    %21 = tpu.iota {dimensions = array<i32: 1>} : vector<8x128xi32>
    %22 = vector.broadcast %20 : i32 to vector<8x128xi32>
    %23 = arith.addi %22, %21 : vector<8x128xi32>
    %c0_10 = arith.constant 0 : index
    %c0_11 = arith.constant 0 : index
    %24 = vector.load %arg5[%c0_10, %c0_11] : memref<8x1xi32, #tpu.memory_space<vmem>>, vector<8x1xi32>
    %25 = vector.broadcast %24 : vector<8x1xi32> to vector<8x128xi32>
    %26 = arith.cmpi eq, %23, %25 : vector<8x128xi32>
    %27 = arith.select %26, %19, %8 : vector<8x128xi1>, vector<8x128xf32>
    %cst_12 = arith.constant 3.000000e+01 : f32
    %28 = vector.broadcast %cst_12 : f32 to vector<8x128xf32>
    %29 = arith.mulf %27, %28 : vector<8x128xf32>
    %c0_13 = arith.constant 0 : index
    %c0_14 = arith.constant 0 : index
    %30 = vector.load %arg6[%c0_13, %c0_14] : memref<8x128xf32, #tpu.memory_space<vmem>>, vector<8x128xf32>
    tpu.vector_store %arg6[%c0_13, %c0_14], %29 {strides = array<i32>} : memref<8x128xf32, #tpu.memory_space<vmem>>, vector<8x128xf32>,
    %c16_i32 = arith.constant 16 : i32
    %31 = vector.broadcast %c16_i32 : i32 to vector<8x128xi32>
    %32 = arith.cmpi slt, %23, %31 : vector<8x128xi32>
    %cst_15 = arith.constant -1.000000e+30 : f32
    %33 = vector.broadcast %cst_15 : f32 to vector<8x128xf32>
    %34 = arith.select %32, %29, %33 : vector<8x128xi1>, vector<8x128xf32>
    %c0_16 = arith.constant 0 : index
    %c0_17 = arith.constant 0 : index
    %35 = vector.load %arg9[%c0_16, %c0_17] : memref<8x1xf32, #tpu.memory_space<vmem>>, vector<8x1xf32>
    %cst_18 = arith.constant dense<0xFF800000> : vector<8xf32>
    %36 = vector.multi_reduction <maximumf>, %34, %cst_18 [1] : vector<8x128xf32> to vector<8xf32>
    %37 = vector.shape_cast %36 : vector<8xf32> to vector<8x1xf32>
    %38 = arith.maximumf %35, %37 : vector<8x1xf32>
    %c0_19 = arith.constant 0 : index
    %c0_20 = arith.constant 0 : index
    %39 = vector.load %arg9[%c0_19, %c0_20] : memref<8x1xf32, #tpu.memory_space<vmem>>, vector<8x1xf32>
    %40 = arith.subf %39, %38 : vector<8x1xf32>
    %41 = math.exp %40 : vector<8x1xf32>
    %c0_21 = arith.constant 0 : index
    %c0_22 = arith.constant 0 : index
    %42 = vector.load %arg10[%c0_21, %c0_22] : memref<8x1xf32, #tpu.memory_space<vmem>>, vector<8x1xf32>
    %43 = arith.mulf %41, %42 : vector<8x1xf32>
    %44 = vector.broadcast %38 : vector<8x1xf32> to vector<8x128xf32>
    %45 = arith.subf %34, %44 : vector<8x128xf32>
    %46 = math.exp %45 : vector<8x128xf32>
    %cst_23 = arith.constant dense<0.000000e+00> : vector<8xf32>
    %47 = vector.multi_reduction <add>, %46, %cst_23 [1] : vector<8x128xf32> to vector<8xf32>
    %48 = vector.shape_cast %47 : vector<8xf32> to vector<8x1xf32>
    %49 = arith.addf %43, %48 : vector<8x1xf32>
    %c0_24 = arith.constant 0 : index
    %c0_25 = arith.constant 0 : index
    %50 = vector.load %arg10[%c0_24, %c0_25] : memref<8x1xf32, #tpu.memory_space<vmem>>, vector<8x1xf32>
    tpu.vector_store %arg10[%c0_24, %c0_25], %49 {strides = array<i32>} : memref<8x1xf32, #tpu.memory_space<vmem>>, vector<8x1xf32>,
    %c0_26 = arith.constant 0 : index
    %c0_27 = arith.constant 0 : index
    %51 = vector.load %arg9[%c0_26, %c0_27] : memref<8x1xf32, #tpu.memory_space<vmem>>, vector<8x1xf32>
    tpu.vector_store %arg9[%c0_26, %c0_27], %38 {strides = array<i32>} : memref<8x1xf32, #tpu.memory_space<vmem>>, vector<8x1xf32>,
    %c0_28 = arith.constant 0 : index
    %c0_29 = arith.constant 0 : index
    %52 = vector.load %arg11[%c0_28, %c0_29] : memref<8x1xf32, #tpu.memory_space<vmem>>, vector<8x1xf32>
    %cst_30 = arith.constant 0.000000e+00 : f32
    %53 = vector.broadcast %cst_30 : f32 to vector<8x128xf32>
    %54 = arith.select %26, %29, %53 : vector<8x128xi1>, vector<8x128xf32>
    %cst_31 = arith.constant dense<0.000000e+00> : vector<8xf32>
    %55 = vector.multi_reduction <add>, %54, %cst_31 [1] : vector<8x128xf32> to vector<8xf32>
    %56 = vector.shape_cast %55 : vector<8xf32> to vector<8x1xf32>
    %57 = arith.addf %52, %56 : vector<8x1xf32>
    %c0_32 = arith.constant 0 : index
    %c0_33 = arith.constant 0 : index
    %58 = vector.load %arg11[%c0_32, %c0_33] : memref<8x1xf32, #tpu.memory_space<vmem>>, vector<8x1xf32>
    tpu.vector_store %arg11[%c0_32, %c0_33], %57 {strides = array<i32>} : memref<8x1xf32, #tpu.memory_space<vmem>>, vector<8x1xf32>,
    %c0_i32_34 = arith.constant 0 : i32
    %59 = arith.cmpi eq, %arg1, %c0_i32_34 : i32
    %60 = arith.extui %59 : i1 to i32
    %c0_i32_35 = arith.constant 0 : i32
    %61 = arith.cmpi ne, %60, %c0_i32_35 : i32
    scf.if %61 {
      %c0_36 = arith.constant 0 : index
      %c0_37 = arith.constant 0 : index
      %62 = vector.load %arg9[%c0_36, %c0_37] : memref<8x1xf32, #tpu.memory_space<vmem>>, vector<8x1xf32>
      %c0_38 = arith.constant 0 : index
      %c0_39 = arith.constant 0 : index
      %63 = vector.load %arg10[%c0_38, %c0_39] : memref<8x1xf32, #tpu.memory_space<vmem>>, vector<8x1xf32>
      %64 = math.log %63 : vector<8x1xf32>
      %65 = arith.addf %62, %64 : vector<8x1xf32>
      %c0_40 = arith.constant 0 : index
      %c0_41 = arith.constant 0 : index
      %66 = vector.load %arg11[%c0_40, %c0_41] : memref<8x1xf32, #tpu.memory_space<vmem>>, vector<8x1xf32>
      %67 = arith.subf %65, %66 : vector<8x1xf32>
      %c0_42 = arith.constant 0 : index
      %c0_43 = arith.constant 0 : index
      %68 = vector.load %arg7[%c0_42, %c0_43] : memref<8x1xf32, #tpu.memory_space<vmem>>, vector<8x1xf32>
      tpu.vector_store %arg7[%c0_42, %c0_43], %67 {strides = array<i32>} : memref<8x1xf32, #tpu.memory_space<vmem>>, vector<8x1xf32>,
    } else {
    }
    return
  }
  func.func @transform_0(%arg0: i32, %arg1: i32) -> (i32, i32) {
    %c0_i32 = arith.constant 0 : i32
    %c0_i32_0 = arith.constant 0 : i32
    return %arg0, %c0_i32 : i32, i32
  }
  func.func @transform_1(%arg0: i32, %arg1: i32) -> (i32, i32) {
    %c0_i32 = arith.constant 0 : i32
    %c0_i32_0 = arith.constant 0 : i32
    return %arg1, %c0_i32 : i32, i32
  }
  func.func @transform_2(%arg0: i32, %arg1: i32) -> (i32, i32) {
    %c0_i32 = arith.constant 0 : i32
    %c0_i32_0 = arith.constant 0 : i32
    return %arg1, %c0_i32 : i32, i32
  }
  func.func @transform_3(%arg0: i32, %arg1: i32) -> (i32, i32) {
    %c0_i32 = arith.constant 0 : i32
    %c0_i32_0 = arith.constant 0 : i32
    return %arg0, %c0_i32 : i32, i32
  }
  func.func @transform_4(%arg0: i32, %arg1: i32) -> (i32, i32) {
    %c0_i32 = arith.constant 0 : i32
    return %arg0, %arg1 : i32, i32
  }
  func.func @transform_5(%arg0: i32, %arg1: i32) -> (i32, i32) {
    %c0_i32 = arith.constant 0 : i32
    %c0_i32_0 = arith.constant 0 : i32
    return %arg0, %c0_i32 : i32, i32
  }
}

</mosaic_0001>

<bundles_post_ra>
// kernel: arc_margin_forward.1
= control target key start
LH: loop header
LB: loop body
LE: loop exit
PB: predicated region body
PF: predicated region fallthrough
CT: control target
= control target key end

     0   :  { %v401_v2 = vmov 0   ;;  %s574_s0 = inlined_call_operand.vmem [shape: f32[8,32], index: 0, kind: input, shape index: {}]   ;;  %s575_s1 = inlined_call_operand.vmem [shape: f32[128,32], index: 1, kind: input, shape index: {}]   ;;  %s576_s2 = inlined_call_operand.vmem [shape: f32[128,1], index: 2, kind: input, shape index: {}]   ;;  %s577_s3 = inlined_call_operand.vmem [shape: s32[8,1], index: 3, kind: input, shape index: {}]   ;;  %s578_s4 = inlined_call_operand.hbm [shape: f32[8,128], index: 4, kind: output, shape index: {0}]   ;;  %s579_s5 = inlined_call_operand.vmem [shape: f32[8,1], index: 5, kind: output, shape index: {1}]  }
   0x1   :  { %v78_v0 = vld [vmem:[%s576_s2 + $0x78] sm:$0xff]  ;;  %v76_v1 = vld [vmem:[%s576_s2 + $0x68] sm:$0xff]  ;;  %363 = vset.pattern.permute.xlu1 %v401_v2  ;;  %362 = vset.pattern.permute.xlu0 %v401_v2 }
   0x2   :  { %v74_v3 = vld [vmem:[%s576_s2 + $0x58] sm:$0xff]  ;;  %156 = vperm.xlu0 %362, %v78_v0   ;;  %146 = vperm.xlu1 %363, %v76_v1  }
   0x3   :  { %364 = vset.pattern.permute.xlu2 %v401_v2 }
   0x4   :  { %136 = vperm.xlu2 %364, %v74_v3  }
   0x5   :  { %11 = vsyncpa [#allocation7], 0  ;;  %v77_v4 = vld [vmem:[%s576_s2 + $0x70] sm:$0xff]  ;;  %v75_v5 = vld [vmem:[%s576_s2 + $0x60] sm:$0xff]  ;;  %vm26_vm0 = vcmask 261120   ;;  %vm43_vm4 = vcmask 7168  }
   0x6   :  { %v73_v6 = vld [vmem:[%s576_s2 + $0x50] sm:$0xff]  ;;  %v72_v7 = vld [vmem:[%s576_s2 + $0x48] sm:$0xff]  ;;  %v71_v8 = vld [vmem:[%s576_s2 + $0x40] sm:$0xff]  ;;  %s328_s8 = sshll.u32 %s578_s4, 4  ;;  %s329_s8 = int_to_ptr.hbm [resolvable:$true] %s328_s8 }
   0x7   :  { %v70_v9 = vld [vmem:[%s576_s2 + $0x38] sm:$0xff]  ;;  %v69_v10 = vld [vmem:[%s576_s2 + $0x30] sm:$0xff]  ;;  %v68_v11 = vld [vmem:[%s576_s2 + $0x28] sm:$0xff] }
   0x8   :  { %v67_v12 = vld [vmem:[%s576_s2 + $0x20] sm:$0xff]  ;;  %v66_v13 = vld [vmem:[%s576_s2 + $0x18] sm:$0xff]  ;;  %v65_v14 = vld [vmem:[%s576_s2 + $0x10] sm:$0xff] }
   0x9   :  { %v64_v15 = vld [vmem:[%s576_s2 + $0x8] sm:$0xff]  ;;  %v63_v16 = vld [vmem:[%s576_s2] sm:$0xff]  ;;  %v62_v21 = vld [vmem:[%s575_s1 + $0x78] sm:$0xff] }
   0xa   :  { %151 = vperm.xlu0 %362, %v77_v4   ;;  %141 = vperm.xlu1 %363, %v75_v5   ;;  %v271_v17 = vld [vmem:[%s577_s3] sm:$0xff]  ;;  %v61_v25 = vld [vmem:[%s575_s1 + $0x70] sm:$0xff]  ;;  %v60_v26 = vld [vmem:[%s575_s1 + $0x68] sm:$0xff] }
   0xb   :  { %v489_v18 = vld [vmem:[%s574_s0] sm:$0xff]  ;;  %v58_v34 = vld [vmem:[%s575_s1 + $0x58] sm:$0xff]  ;;  %v57_v37 = vld [vmem:[%s575_s1 + $0x50] sm:$0xff] }
   0xc   :  { %131 = vperm.xlu2 %364, %v73_v6   ;;  %v25_v19 = vmul.f32 %v489_v18, %v489_v18  ;;  %v59_v32 = vld [vmem:[%s575_s1 + $0x60] sm:$0xff]  ;;  %v56_v41 = vld [vmem:[%s575_s1 + $0x48] sm:$0xff]  ;;  %v54_v45 = vld [vmem:[%s575_s1 + $0x38] sm:$0xff] }
   0xd   :  { %v55_v44 = vld [vmem:[%s575_s1 + $0x40] sm:$0xff]  ;;  %v53_v49 = vld [vmem:[%s575_s1 + $0x30] sm:$0xff]  ;;  %v52_v52 = vld [vmem:[%s575_s1 + $0x28] sm:$0xff] }
   0xe   :  { %v27_v20 = vsel %vm26_vm0, %v25_v19, 0.0  ;;  %v51_v55 = vld [vmem:[%s575_s1 + $0x20] sm:$0xff]  ;;  %v50_v58 = vld [vmem:[%s575_s1 + $0x18] sm:$0xff]  ;;  %v49_v61 = vld [vmem:[%s575_s1 + $0x10] sm:$0xff] }
   0xf   :  { %v48_v63 = vld [vmem:[%s575_s1 + $0x8] sm:$0xff]  ;;  %v47_v5 = vld [vmem:[%s575_s1] sm:$0xff]  ;;  %s404_s1 = smov [#allocation6]  }
  0x10   :  { %s326_s30 = sshll.u32 %s404_s1, 4  ;;  %s327_s30 = int_to_ptr.vmem [resolvable:$true] %s326_s30 }
  0x12   :  { %126 = vperm.xlu0 %362, %v72_v7   ;;  %121 = vperm.xlu1 %363, %v71_v8  }
  0x14   :  { %116 = vperm.xlu2 %364, %v70_v9  }
  0x1a   :  { %111 = vperm.xlu1 %363, %v69_v10  }
  0x1c   :  { %106 = vperm.xlu2 %364, %v68_v11  }
  0x22   :  { %101 = vperm.xlu1 %363, %v67_v12  }
  0x24   :  { %96 = vperm.xlu2 %364, %v66_v13  }
  0x2a   :  { %91 = vperm.xlu1 %363, %v65_v14  }
  0x2c   :  { %86 = vperm.xlu2 %364, %v64_v15  }
  0x32   :  { %81 = vperm.xlu1 %363, %v63_v16  }
  0x34   :  { %273 = vperm.xlu2 %364, %v271_v17  }
  0x3c   :  { %28 = vadd.xlane.f32.xlu0 %v27_v20 }
  0x5e   :  { %v137_v29 = vpop.permute.xlu2 %136 }
  0x5f   :  { %v170_v35 = vmul.f32 %v137_v29, %v58_v34 }
  0x66   :  { %v132_v36 = vpop.permute.xlu2 %131 }
  0x67   :  { %v169_v39 = vmul.f32 %v132_v36, %v57_v37 }
  0x6e   :  { %v117_v43 = vpop.permute.xlu2 %116 }
  0x6f   :  { %v166_v48 = vmul.f32 %v117_v43, %v54_v45 }
  0x74   :  { %v157_v22 = vpop.permute.xlu0 %156  ;;  %v147_v24 = vpop.permute.xlu1 %146 }
  0x75   :  { %v174_v23 = vmul.f32 %v157_v22, %v62_v21  ;;  %v172_v30 = vmul.f32 %v147_v24, %v60_v26  ;;  %v402_v21 = vmov 0.0  }
  0x76   :  { %v107_v50 = vpop.permute.xlu2 %106  ;;  %46 = vst.msk [vmem:[#allocation5] sm:$0xff] %vm43_vm4, %v402_v21 }
  0x77   :  { %341 = vmatpush.xpose.msk.msra.mxu0 %vm26_vm0, %v174_v23  ;;  %v164_v54 = vmul.f32 %v107_v50, %v52_v52  ;;  %45 = vst.msk [vmem:[#allocation4] sm:$0xff] %vm43_vm4, %v402_v21 }
  0x7c   :  { %v152_v27 = vpop.permute.xlu0 %151  ;;  %v142_v31 = vpop.permute.xlu1 %141 }
  0x7d   :  { %v173_v28 = vmul.f32 %v152_v27, %v61_v25  ;;  %v171_v33 = vmul.f32 %v142_v31, %v59_v32  ;;  %v267_v27 = vlaneseq }
  0x7e   :  { %v97_v57 = vpop.permute.xlu2 %96 }
  0x7f   :  { %342 = vmatpush.xpose.msk.msra.mxu0 %vm26_vm0, %v173_v28  ;;  %v162_v60 = vmul.f32 %v97_v57, %v50_v58  ;;  %v268_v31 = vand.u32 127, %v267_v27 }
  0x81   :  { %vm279_vm8 = vcmp.lt.s32.totalorder %v268_v31, 16 }
  0x83   :  { %343 = vmatpush.xpose.msk.msra.mxu0 %vm26_vm0, %v172_v30 }
  0x84   :  { %v122_v38 = vpop.permute.xlu1 %121  ;;  %v127_v40 = vpop.permute.xlu0 %126 }
  0x85   :  { %v168_v42 = vmul.f32 %v127_v40, %v56_v41  ;;  %v167_v47 = vmul.f32 %v122_v38, %v55_v44  ;;  %v403_v41 = vmov -1e+30  }
  0x86   :  { %v87_v1 = vpop.permute.xlu2 %86  ;;  %44 = vst.msk [vmem:[#allocation3] sm:$0xff] %vm43_vm4, %v403_v41 }
  0x87   :  { %344 = vmatpush.xpose.msk.msra.mxu0 %vm26_vm0, %v171_v33  ;;  %v160_v3 = vmul.f32 %v87_v1, %v48_v63 }
  0x8b   :  { %345 = vmatpush.xpose.msk.msra.mxu0 %vm26_vm0, %v170_v35 }
  0x8c   :  { %v112_v46 = vpop.permute.xlu1 %111 }
  0x8d   :  { %v165_v51 = vmul.f32 %v112_v46, %v53_v49  ;;  %v281_v43 = vld [vmem:[#allocation3] sm:$0xff] }
  0x8e   :  { %v274_v33 = vpop.permute.xlu2 %273 }
  0x8f   :  { %346 = vmatpush.xpose.msk.msra.mxu0 %vm26_vm0, %v169_v39  ;;  %vm275_vm7 = vcmp.eq.s32.totalorder %v268_v31, %v274_v33 }
  0x93   :  { %347 = vmatpush.xpose.msk.msra.mxu0 %vm26_vm0, %v168_v42  ;;  %v304_v42 = vld [vmem:[#allocation5] sm:$0xff] }
  0x94   :  { %v102_v53 = vpop.permute.xlu1 %101 }
  0x95   :  { %v163_v56 = vmul.f32 %v102_v53, %v51_v55  ;;  %v288_v55 = vld [vmem:[#allocation4] sm:$0xff] }
  0x97   :  { %348 = vmatpush.xpose.msk.msra.mxu0 %vm26_vm0, %v167_v47 }
  0x9b   :  { %349 = vmatpush.xpose.msk.msra.mxu0 %vm26_vm0, %v166_v48 }
  0x9c   :  { %v92_v59 = vpop.permute.xlu1 %91 }
  0x9d   :  { %v161_v62 = vmul.f32 %v92_v59, %v49_v61 }
  0x9f   :  { %350 = vmatpush.xpose.msk.msra.mxu0 %vm26_vm0, %v165_v51 }
  0xa3   :  { %351 = vmatpush.xpose.msk.msra.mxu0 %vm26_vm0, %v164_v54 }
  0xa4   :  { %v82_v4 = vpop.permute.xlu1 %81 }
  0xa5   :  { %v159_v6 = vmul.f32 %v82_v4, %v47_v5 }
  0xa7   :  { %352 = vmatpush.xpose.msk.msra.mxu0 %vm26_vm0, %v163_v56 }
  0xab   :  { %353 = vmatpush.xpose.msk.msra.mxu0 %vm26_vm0, %v162_v60 }
  0xaf   :  { %354 = vmatpush.xpose.msk.msra.mxu0 %vm26_vm0, %v161_v62  ;;  %v29_v0 = vpop.xlane.xlu0 %28 }
  0xb0   :  { %v30_v2 = vmax.f32 %v29_v0, 1e-24 }
  0xb2   :  { %365 = vrsqrt.f32 %v30_v2  ;;  %vm37_vm2 = vweird.f32 %v30_v2 }
  0xb3   :  { %355 = vmatpush.xpose.msk.msra.mxu0 %vm26_vm0, %v160_v3 }
  0xb7   :  { %356 = vmatpush.xpose.msk.msra.mxu0 %vm26_vm0, %v159_v6 }
  0xb8   :  { %v366_v7 = vpop.eup %365 }
  0xb9   :  { %v32_v8 = vmul.f32 %v366_v7, %v30_v2  ;;  %vm38_vm1 = vweird.f32 %v366_v7 }
  0xba   :  { %vm39_vm3 = vmor %vm37_vm2, %vm38_vm1 }
  0xbb   :  { %v33_v9 = vmul.f32 %v366_v7, %v32_v8 }
  0xbd   :  { %v34_v10 = vmul.f32 0.5, %v33_v9 }
  0xbf   :  { %v35_v11 = vsub.f32 1.5, %v34_v10 }
  0xc1   :  { %v36_v12 = vmul.f32 %v366_v7, %v35_v11 }
  0xc3   :  { %v40_v13 = vsel %vm39_vm3, %v366_v7, %v36_v12 }
  0xc4   :  { %v41_v14 = vmul.f32 %v40_v13, %v489_v18 }
  0xc6   :  { %42 = vst.msk [vmem:[#allocation2] sm:$0xff] %vm26_vm0, %v41_v14 }
  0xcd   :  { %v175_v15 = vld [vmem:[#allocation2] sm:$0xff] }
  0xce   :  { %357 = vmatmul.msk.f32.vlgmr.msra.gmra.mxu0 %vm26_vm0, %v175_v15 }
 0x14b   :  { %v245_v16 = vpop.f32.mrf.mxu0 }
 0x14c   :  { %v248_v17 = vmul.f32 %v245_v16, %v245_v16  ;;  %v263_v34 = vmul.f32 0.87758255, %v245_v16 }
 0x14e   :  { %v249_v19 = vsub.f32 1.0, %v248_v17 }
 0x150   :  { %v250_v20 = vmax.f32 %v249_v19, 0.0 }
 0x152   :  { %367 = vrsqrt.f32 %v250_v20  ;;  %vm258_vm5 = vcmp.eq.f32.partialorder %v250_v20, inf  ;;  %v261_v29 = vand.u32 2147483648, %v250_v20  ;;  %vm260_vm6 = vcmp.eq.f32.partialorder %v250_v20, 0.0 }
 0x158   :  { %v368_v22 = vpop.eup %367 }
 0x159   :  { %v252_v23 = vmul.f32 %v368_v22, %v250_v20 }
 0x15b   :  { %v253_v24 = vmul.f32 %v368_v22, %v252_v23 }
 0x15d   :  { %v254_v18 = vmul.f32 0.5, %v253_v24 }
 0x15f   :  { %v255_v25 = vsub.f32 1.5, %v254_v18 }
 0x161   :  { %v256_v26 = vmul.f32 %v368_v22, %v255_v25 }
 0x163   :  { %v257_v28 = vmul.f32 %v256_v26, %v250_v20 }
 0x165   :  { %v259_v30 = vsel %vm258_vm5, %v250_v20, %v257_v28 }
 0x166   :  { %v262_v32 = vsel %vm260_vm6, %v261_v29, %v259_v30 }
 0x167   :  { %v264_v35 = vmul.f32 0.47942555, %v262_v32 }
 0x169   :  { %v265_v36 = vsub.f32 %v263_v34, %v264_v35 }
 0x16b   :  { %v276_v37 = vsel %vm275_vm7, %v265_v36, %v245_v16 }
 0x16c   :  { %v277_v38 = vmul.f32 30.0, %v276_v37 }
 0x16e   :  { %278 = vst [vmem:[#allocation6] sm:$0xff] %v277_v38  ;;  %v305_v39 = vsel %vm275_vm7, %v277_v38, 0.0  ;;  %v280_v40 = vsel %vm279_vm8, %v277_v38, -1e+30 }
 0x16f   :  { %306 = vadd.xlane.f32.xlu0 %v305_v39  ;;  %282 = vmax.xlane.f32.xlu1 %v280_v40  ;;  %331 = dma.vmem_to_hbm [thread:$0]  %s327_s30, 128, %s329_s8, [#allocation7]  }
 0x1e2   :  { %v307_v44 = vpop.xlane.xlu0 %306  ;;  %v283_v45 = vpop.xlane.xlu1 %282 }
 0x1e3   :  { %v308_v46 = vadd.f32 %v307_v44, %v304_v42  ;;  %v284_v47 = vmax.f32 %v281_v43, %v283_v45 }
 0x1e5   :  { %309 = vst.msk [vmem:[#allocation5] sm:$0xff] %vm43_vm4, %v308_v46  ;;  %v285_v48 = vsub.f32 %v281_v43, %v284_v47  ;;  %292 = vperm.xlu2 %364, %v284_v47  }
 0x1e6   :  { %303 = vst.msk [vmem:[#allocation3] sm:$0xff] %vm43_vm4, %v284_v47 }
 0x1e7   :  { %v286_v53 = vmul.f32 1.442695, %v285_v48 }
 0x1ec   :  { %v318_v0 = vld [vmem:[#allocation5] sm:$0xff] }
 0x1ed   :  { %v313_v62 = vld [vmem:[#allocation3] sm:$0xff] }
 0x23f   :  { %v293_v49 = vpop.permute.xlu2 %292 }
 0x240   :  { %v295_v50 = vsub.f32 %v280_v40, %v293_v49 }
 0x242   :  { %v296_v51 = vmul.f32 1.442695, %v295_v50 }
 0x244   :  { %369 = vpow2.f32 %v296_v51 }
 0x245   :  { %371 = vpow2.f32 %v286_v53 }
 0x24a   :  { %v370_v52 = vpop.eup %369 }
 0x24b   :  { %298 = vadd.xlane.f32.xlu2 %v370_v52  ;;  %v372_v54 = vpop.eup %371 }
 0x24c   :  { %v289_v56 = vmul.f32 %v372_v54, %v288_v55 }
 0x2be   :  { %v299_v57 = vpop.xlane.xlu2 %298 }
 0x2bf   :  { %v300_v58 = vadd.f32 %v299_v57, %v289_v56 }
 0x2c1   :  { %302 = vst.msk [vmem:[#allocation4] sm:$0xff] %vm43_vm4, %v300_v58 }
 0x2c8   :  { %v314_v59 = vld [vmem:[#allocation4] sm:$0xff] }
 0x2c9   :  { %373 = vlog2.f32 %v314_v59 }
 0x2cf   :  { %v374_v60 = vpop.eup %373 }
 0x2d0   :  { %v316_v61 = vmul.f32 0.6931472, %v374_v60 }
 0x2d2   :  { %v317_v63 = vadd.f32 %v316_v61, %v313_v62 }
 0x2d4   :  { %v319_v1 = vsub.f32 %v317_v63, %v318_v0 }
 0x2d6   :  { %320 = vst.msk [vmem:[%s579_s5] sm:$0xff] %vm43_vm4, %v319_v1 }
 0x2d7   :  { %399 = dma.done.wait [#allocation7], 128  }
 0x2d8   :  { %400 = vsyncadd [#allocation7], 4294967168 }
 0x2d9   :  { %340 = vsyncpa [#allocation7], 1 }

</bundles_post_ra>
